<compile_context>
chip_gen: v7x
topology: tpu7x:2x2x1
jax: 0.10.0
libtpu: 0.0.40
codegen_flags: <defaults>
</compile_context>

<pallas_src>
import functools

import jax
import jax.numpy as jnp
from jax import lax
from jax.experimental import pallas as pl
from jax.experimental.pallas import tpu as pltpu


_CHUNK_TARGET_BYTES = 2 << 20   # f32 working-chunk target inside the resident kernel


# ----------------------------------------------------------------------------
# helpers
# ----------------------------------------------------------------------------

def _round_up(a, b):
    return ((a + b - 1) // b) * b


def _vmem_limit_bytes():
    """Generation-aware VMEM budget (~3/4 of physical VMEM)."""
    try:
        cap = int(pltpu.get_tpu_info().vmem_capacity_bytes)
    except Exception:
        cap = 64 << 20          # conservative fallback (v7x-sized)
    return (cap * 3) // 4       # ~96 MiB on v5e/v6e, ~48 MiB on v7x


def _full_spec(shape):
    """Whole-array block, constant index map (works with or without a grid)."""
    return pl.BlockSpec(shape, lambda *_: (0,) * len(shape))


def _finalize_stats(s, ss, gamma, beta, mm, mv, eps, momentum, count):
    """Fold per-channel sums into scale/shift and updated moving stats.

    Works on any matching shapes; used both in-kernel (resident path) and in
    plain JAX (tiled path).  Variance is the biased E[x^2] - mean^2 estimate
    (f32 accumulation, clamped >= 0), matching the reference module which uses
    biased variance for both normalization and the moving update.
    """
    inv_n = 1.0 / count
    mean = s * inv_n
    var = jnp.maximum(ss * inv_n - mean * mean, 0.0)
    inv_std = lax.rsqrt(var + eps)                      # EUP rsqrt in-kernel
    scale = gamma * inv_std
    shift = beta - scale * mean
    new_mm = (1.0 - momentum) * mm + momentum * mean
    new_mv = (1.0 - momentum) * mv + momentum * var
    return scale, shift, new_mm, new_mv


# ----------------------------------------------------------------------------
# kernels
# ----------------------------------------------------------------------------

def _bn_resident_kernel(x_ref, g_ref, b_ref, mm_ref, mv_ref,
                        y_ref, nmm_ref, nmv_ref, *, eps, momentum, count, cn):
    """Whole activation resident in VMEM: stats + normalize in one HBM pass.

    Statistics are accumulated over chunks of `cn` leading-axis slabs so that
    the f32 temporaries stay bounded (no full-size x*x buffer).  x_ref is
    (N, C, H*W) for 4-D inputs (reduce axes 0 and 2) or (N, C) for 2-D inputs
    (reduce axis 0).
    """
    nd = len(x_ref.shape)
    reduce_axes = (0, 2) if nd == 3 else (0,)
    acc_shape = g_ref.shape                 # (1, C, 1) or (1, C)
    n_major = x_ref.shape[0]
    nfull = n_major // cn
    rem = n_major - nfull * cn
    hint_align = 8 if (nd == 2 and cn % 8 == 0) else 0

    def _start(k):
        start = k * cn
        if hint_align:
            start = pl.multiple_of(start, hint_align)
        return start

    def _add_chunk(xs, s, ss):
        xs = xs.astype(jnp.float32)
        s = s + jnp.sum(xs, axis=reduce_axes, keepdims=True)
        ss = ss + jnp.sum(xs * xs, axis=reduce_axes, keepdims=True)
        return s, ss

    zero = jnp.zeros(acc_shape, jnp.float32)

    def _stats_body(k, carry):
        s, ss = carry
        return _add_chunk(x_ref[pl.ds(_start(k), cn)], s, ss)

    s, ss = lax.fori_loop(0, nfull, _stats_body, (zero, zero))
    if rem:                                  # static tail (shapes are static)
        s, ss = _add_chunk(x_ref[pl.ds(nfull * cn, rem)], s, ss)

    scale, shift, nmm, nmv = _finalize_stats(
        s, ss, g_ref[...], b_ref[...], mm_ref[...], mv_ref[...],
        eps, momentum, count)
    nmm_ref[...] = nmm
    nmv_ref[...] = nmv

    def _write_chunk(sl):
        xs = x_ref[sl].astype(jnp.float32)
        y_ref[sl] = (xs * scale + shift).astype(y_ref.dtype)

    def _norm_body(k, carry):
        _write_chunk(pl.ds(_start(k), cn))
        return carry

    lax.fori_loop(0, nfull, _norm_body, 0)
    if rem:
        _write_chunk(pl.ds(nfull * cn, rem))


def _bn_rowstats_kernel(x_ref, rsum_ref, rsumsq_ref, *, hw_total, thw, need_mask):
    """Tiled 4-D pass 1: per-row (n,c) partial sum / sum-sq over the HW axis.

    Grid = (row tiles [parallel], HW tiles [arbitrary]).  The (tr, 1) output
    blocks stay resident across the HW axis and accumulate; the ragged HW tail
    is masked with a lane iota so padded lanes never corrupt the sums.  Rows
    past the end of the array produce garbage sums, but their output writes are
    masked by Pallas and never read downstream.
    """
    @pl.when(pl.program_id(1) == 0)
    def _init():
        rsum_ref[...] = jnp.zeros_like(rsum_ref)
        rsumsq_ref[...] = jnp.zeros_like(rsumsq_ref)

    x = x_ref[...].astype(jnp.float32)
    if need_mask:
        rem = hw_total - pl.program_id(1) * thw
        lane = lax.broadcasted_iota(jnp.int32, x.shape, 1)
        x = jnp.where(lane < rem, x, 0.0)

    rsum_ref[...] += jnp.sum(x, axis=1, keepdims=True)
    rsumsq_ref[...] += jnp.sum(x * x, axis=1, keepdims=True)


def _bn_colstats_kernel(x_ref, psum_ref, psumsq_ref, *, n_total, tm, need_mask):
    """Tiled 2-D pass 1: per-tile partial per-channel sums (channels on lanes).

    One grid axis over row tiles, all tiles independent ("parallel").  The
    ragged batch tail is masked with a sublane iota before the column sums.
    """
    x = x_ref[...].astype(jnp.float32)
    if need_mask:
        rem = n_total - pl.program_id(0) * tm
        row = lax.broadcasted_iota(jnp.int32, x.shape, 0)
        x = jnp.where(row < rem, x, 0.0)

    psum_ref[...] = jnp.sum(x, axis=0, keepdims=True).reshape(psum_ref.shape)
    psumsq_ref[...] = jnp.sum(x * x, axis=0, keepdims=True).reshape(psumsq_ref.shape)


def _bn_norm_kernel(x_ref, scale_ref, shift_ref, y_ref):
    """Pass 2: y = x * scale + shift (one FMA per element).

    scale/shift broadcast from (tr, 1) (4-D row view) or (1, C) (2-D view).
    """
    x = x_ref[...].astype(jnp.float32)
    y_ref[...] = (x * scale_ref[...] + shift_ref[...]).astype(y_ref.dtype)


# ----------------------------------------------------------------------------
# dispatch paths
# ----------------------------------------------------------------------------

def _bn_resident(xk, g, b, mm, mv, eps, momentum, count, cn, vmem_limit):
    pshape = g.shape
    kernel = functools.partial(_bn_resident_kernel, eps=eps, momentum=momentum,
                               count=count, cn=cn)
    return pl.pallas_call(
        kernel,
        out_shape=(jax.ShapeDtypeStruct(xk.shape, xk.dtype),
                   jax.ShapeDtypeStruct(pshape, jnp.float32),
                   jax.ShapeDtypeStruct(pshape, jnp.float32)),
        in_specs=[_full_spec(xk.shape)] + [_full_spec(pshape)] * 4,
        out_specs=(_full_spec(xk.shape), _full_spec(pshape), _full_spec(pshape)),
        compiler_params=pltpu.CompilerParams(vmem_limit_bytes=vmem_limit),
    )(xk, g, b, mm, mv)


def _bn_tiled_nchw(xm, g, b, mm, mv, eps, momentum, count, vmem_limit,
                   block_target_bytes, max_hw_tile, N, C):
    """Tiled two-pass path for 4-D inputs viewed as (N*C, H*W)."""
    R, HW = xm.shape

    # Lane tile: always a 128-multiple (ragged tail handled with cdiv + mask).
    max_hw_tile = max(128, (max_hw_tile // 128) * 128)
    thw = min(_round_up(HW, 128), max_hw_tile)
    # Row tile: multiple of 8 sublanes, sized so pass 2's four double-buffered
    # tiles stay within the generation-aware VMEM budget.
    if R <= 8:
        tr = R
    else:
        tr = max(8, ((block_target_bytes // (thw * 4)) // 8) * 8)
        tr = min(tr, _round_up(R, 8))
    # TODO(synk): for extreme C (a single 8 x thw row tile exceeding the VMEM
    # budget) the channel axis would also need blocking.

    gr = pl.cdiv(R, tr)
    ghw = pl.cdiv(HW, thw)
    need_mask = (HW % thw) != 0

    x_spec = pl.BlockSpec((tr, thw), lambda i, j: (i, j))
    rowp_spec = pl.BlockSpec((tr, 1), lambda i, j: (i, 0))

    # --- Pass 1: per-row partial sums.  Row axis "parallel" (both v7x cores
    # stream disjoint row ranges); HW axis "arbitrary" (innermost reduction).
    stats_kernel = functools.partial(_bn_rowstats_kernel, hw_total=HW, thw=thw,
                                     need_mask=need_mask)
    rsum, rsumsq = pl.pallas_call(
        stats_kernel,
        grid=(gr, ghw),
        out_shape=(jax.ShapeDtypeStruct((R, 1), jnp.float32),
                   jax.ShapeDtypeStruct((R, 1), jnp.float32)),
        in_specs=[x_spec],
        out_specs=(rowp_spec, rowp_spec),
        compiler_params=pltpu.CompilerParams(
            dimension_semantics=("parallel", "arbitrary"),
            vmem_limit_bytes=vmem_limit),
    )(xm)

    # --- Tiny per-channel finalize in plain JAX (C-sized arrays).
    s = rsum.reshape(N, C).sum(axis=0)
    ss = rsumsq.reshape(N, C).sum(axis=0)
    scale, shift, nmm, nmv = _finalize_stats(s, ss, g, b, mm, mv,
                                             eps, momentum, count)
    scale_rows = jnp.broadcast_to(scale[None, :], (N, C)).reshape(R, 1)
    shift_rows = jnp.broadcast_to(shift[None, :], (N, C)).reshape(R, 1)

    # --- Pass 2: elementwise normalize; fully independent tiles.
    y = pl.pallas_call(
        _bn_norm_kernel,
        grid=(gr, ghw),
        out_shape=jax.ShapeDtypeStruct((R, HW), xm.dtype),
        in_specs=[x_spec, rowp_spec, rowp_spec],
        out_specs=x_spec,
        compiler_params=pltpu.CompilerParams(
            dimension_semantics=("parallel", "parallel"),
            vmem_limit_bytes=vmem_limit),
    )(xm, scale_rows, shift_rows)
    return y, nmm, nmv


def _bn_tiled_2d(x, g, b, mm, mv, eps, momentum, count, vmem_limit,
                 block_target_bytes):
    """Tiled two-pass path for 2-D (N, C) inputs (channels on lanes)."""
    N, C = x.shape
    c_pad = _round_up(C, 128)
    if N <= 8:
        tm = N
    else:
        tm = max(8, ((block_target_bytes // (c_pad * 4)) // 8) * 8)
        tm = min(tm, _round_up(N, 8))
    # TODO(synk): for very large C the lane axis would also need blocking and,
    # when C is far below 128, padding C would avoid masked partial stores.

    gm = pl.cdiv(N, tm)
    need_mask = (N % tm) != 0

    x_spec = pl.BlockSpec((tm, C), lambda i: (i, 0))
    psum_spec = pl.BlockSpec((1, 1, C), lambda i: (i, 0, 0))

    stats_kernel = functools.partial(_bn_colstats_kernel, n_total=N, tm=tm,
                                     need_mask=need_mask)
    psum, psumsq = pl.pallas_call(
        stats_kernel,
        grid=(gm,),
        out_shape=(jax.ShapeDtypeStruct((gm, 1, C), jnp.float32),
                   jax.ShapeDtypeStruct((gm, 1, C), jnp.float32)),
        in_specs=[x_spec],
        out_specs=(psum_spec, psum_spec),
        compiler_params=pltpu.CompilerParams(
            dimension_semantics=("parallel",),
            vmem_limit_bytes=vmem_limit),
    )(x)

    s = psum.sum(axis=(0, 1))
    ss = psumsq.sum(axis=(0, 1))
    scale, shift, nmm, nmv = _finalize_stats(s, ss, g, b, mm, mv,
                                             eps, momentum, count)

    p_spec = pl.BlockSpec((1, C), lambda i: (0, 0))
    y = pl.pallas_call(
        _bn_norm_kernel,
        grid=(gm,),
        out_shape=jax.ShapeDtypeStruct((N, C), x.dtype),
        in_specs=[x_spec, p_spec, p_spec],
        out_specs=x_spec,
        compiler_params=pltpu.CompilerParams(
            dimension_semantics=("parallel",),
            vmem_limit_bytes=vmem_limit),
    )(x, scale.reshape(1, C), shift.reshape(1, C))
    return y, nmm, nmv


# ----------------------------------------------------------------------------
# public wrapper (training-mode forward, as in the PyTorch module under grad)
# ----------------------------------------------------------------------------

def batch_norm_pallas(x, gamma, beta, moving_mean, moving_var,
                      eps=1e-5, momentum=0.1, *, force_tiled=False,
                      block_target_bytes=None, max_hw_tile=2048):
    """Returns (Y, new_moving_mean, new_moving_var), matching batch_norm()."""
    assert x.ndim in (2, 4), "Input tensor must be 2D or 4D"
    C = x.shape[1]
    vmem_limit = _vmem_limit_bytes()

    # Generation-aware tile bytes (~9.6 MiB on v7x, ~19 MiB on v5e/v6e) so
    # pass 2's four double-buffered tiles never exceed the VMEM budget.
    if block_target_bytes is None:
        block_target_bytes = vmem_limit // 5
    block_target_bytes = min(block_target_bytes, vmem_limit // 5)

    gflat = gamma.reshape(-1).astype(jnp.float32)
    bflat = beta.reshape(-1).astype(jnp.float32)
    mmflat = moving_mean.reshape(-1).astype(jnp.float32)
    mvflat = moving_var.reshape(-1).astype(jnp.float32)

    itemsize = x.dtype.itemsize
    if x.ndim == 4:
        N, _, H, W = x.shape
        HW = H * W
        count = float(N * HW)
        # Resident-path accounting with (8,128)-padded VMEM footprints.
        pad_bytes = N * _round_up(C, 8) * _round_up(HW, 128) * itemsize
        slab_f32 = _round_up(C, 8) * _round_up(HW, 128) * 4
        cn = min(N, max(1, _CHUNK_TARGET_BYTES // slab_f32))
        chunk_f32 = cn * slab_f32
    else:
        N = x.shape[0]
        count = float(N)
        pad_bytes = _round_up(N, 8) * _round_up(C, 128) * itemsize
        row_f32 = _round_up(C, 128) * 4
        cn = max(8, ((_CHUNK_TARGET_BYTES // row_f32) // 8) * 8)
        cn = min(cn, N)
        chunk_f32 = cn * row_f32

    # Resident fast path (one HBM read of x + one write of y, i.e. 2x traffic
    # vs 3x for the tiled path).  Chunked in-kernel accumulation bounds the f32
    # temporaries, so the threshold is x-in + y-out + a few chunks + slack.
    resident_bytes = 2 * pad_bytes + 4 * chunk_f32 + (4 << 20)
    use_resident = (not force_tiled) and resident_bytes <= vmem_limit

    if use_resident:
        if x.ndim == 4:
            xk = x.reshape(N, C, HW)            # free view of NCHW
            pshape = (1, C, 1)
        else:
            xk = x
            pshape = (1, C)
        y2, nmm, nmv = _bn_resident(
            xk, gflat.reshape(pshape), bflat.reshape(pshape),
            mmflat.reshape(pshape), mvflat.reshape(pshape),
            eps, momentum, count, cn, vmem_limit)
    else:
        if x.ndim == 4:
            xm = x.reshape(N * C, HW)           # free row view: sublane-dense
            y2, nmm, nmv = _bn_tiled_nchw(
                xm, gflat, bflat, mmflat, mvflat, eps, momentum, count,
                vmem_limit, block_target_bytes, max_hw_tile, N, C)
        else:
            y2, nmm, nmv = _bn_tiled_2d(
                x, gflat, bflat, mmflat, mvflat, eps, momentum, count,
                vmem_limit, block_target_bytes)

    y = y2.reshape(x.shape)
    new_mm = nmm.reshape(moving_mean.shape).astype(moving_mean.dtype)
    new_mv = nmv.reshape(moving_var.shape).astype(moving_var.dtype)
    return y, new_mm, new_mv


# ----------------------------------------------------------------------------
# pure-JAX reference (mirrors the PyTorch batch_norm training branch)
# ----------------------------------------------------------------------------

def _reference(x, gamma, beta, moving_mean, moving_var, eps=1e-5, momentum=0.1):
    if x.ndim == 2:
        mean = x.mean(axis=0)
        var = ((x - mean) ** 2).mean(axis=0)
    else:
        mean = x.mean(axis=(0, 2, 3), keepdims=True)
        var = ((x - mean) ** 2).mean(axis=(0, 2, 3), keepdims=True)
    x_hat = (x - mean) / jnp.sqrt(var + eps)
    y = gamma * x_hat + beta
    new_mm = (1 - momentum) * moving_mean + momentum * mean.reshape(moving_mean.shape)
    new_mv = (1 - momentum) * moving_var + momentum * var.reshape(moving_var.shape)
    return y, new_mm, new_mv


if __name__ == "__main__":
    key = jax.random.PRNGKey(0)
    k1, k2, k3, k4, k5, k6 = jax.random.split(key, 6)

    # --- Case 1: 4-D NCHW, BatchNorm(num_features=4, num_dims=4), resident path
    N, C, H, W = 2, 4, 16, 16
    x = jax.random.normal(k1, (N, C, H, W), dtype=jnp.float32)
    s4 = (1, C, 1, 1)
    gamma = jnp.ones(s4, jnp.float32)
    beta = jnp.zeros(s4, jnp.float32)
    m_mean = jnp.zeros(s4, jnp.float32)
    m_var = jnp.ones(s4, jnp.float32)

    y, nmm, nmv = batch_norm_pallas(x, gamma, beta, m_mean, m_var)
    jax.block_until_ready((y, nmm, nmv))
    y_r, mm_r, mv_r = _reference(x, gamma, beta, m_mean, m_var)
    assert y.shape == x.shape and nmm.shape == s4 and nmv.shape == s4
    assert jnp.allclose(y, y_r, atol=1e-4, rtol=1e-4)
    assert jnp.allclose(nmm, mm_r, atol=1e-5, rtol=1e-5)
    assert jnp.allclose(nmv, mv_r, atol=1e-5, rtol=1e-5)

    # --- Case 2: 4-D with conv-style ragged HW (14x14=196), forced through the
    # tiled two-pass path: 2 row tiles x 2 HW tiles, masked tails on both axes.
    N2, C2, H2, W2 = 4, 6, 14, 14
    x2 = 1.5 + jax.random.normal(k2, (N2, C2, H2, W2), dtype=jnp.float32)
    s2 = (1, C2, 1, 1)
    g2 = 1.0 + 0.1 * jax.random.normal(k3, s2, dtype=jnp.float32)
    b2 = 0.1 * jax.random.normal(k4, s2, dtype=jnp.float32)
    mm2 = jnp.zeros(s2, jnp.float32)
    mv2 = jnp.ones(s2, jnp.float32)
    y2, nmm2, nmv2 = batch_norm_pallas(
        x2, g2, b2, mm2, mv2,
        force_tiled=True, block_target_bytes=8 * 1024, max_hw_tile=128)
    jax.block_until_ready((y2, nmm2, nmv2))
    y2_r, mm2_r, mv2_r = _reference(x2, g2, b2, mm2, mv2)
    assert jnp.allclose(y2, y2_r, atol=1e-4, rtol=1e-4)
    assert jnp.allclose(nmm2, mm2_r, atol=1e-5, rtol=1e-5)
    assert jnp.allclose(nmv2, mv2_r, atol=1e-5, rtol=1e-5)

    # --- Case 3: 2-D, BatchNorm(num_features=32, num_dims=2), resident path
    x3 = jax.random.normal(k5, (8, 32), dtype=jnp.float32)
    s3 = (1, 32)
    g3 = jnp.ones(s3, jnp.float32)
    b3 = jnp.zeros(s3, jnp.float32)
    mm3 = jnp.zeros(s3, jnp.float32)
    mv3 = jnp.ones(s3, jnp.float32)
    y3, nmm3, nmv3 = batch_norm_pallas(x3, g3, b3, mm3, mv3)
    jax.block_until_ready((y3, nmm3, nmv3))
    y3_r, mm3_r, mv3_r = _reference(x3, g3, b3, mm3, mv3)
    assert jnp.allclose(y3, y3_r, atol=1e-4, rtol=1e-4)
    assert jnp.allclose(nmm3, mm3_r, atol=1e-5, rtol=1e-5)
    assert jnp.allclose(nmv3, mv3_r, atol=1e-5, rtol=1e-5)

    # --- Case 4: 2-D with ragged batch (20 rows), forced through the tiled
    # two-pass path: 3 row tiles of 8 with a masked tail of 4.
    x4 = 0.5 + jax.random.normal(k6, (20, 32), dtype=jnp.float32)
    y4, nmm4, nmv4 = batch_norm_pallas(
        x4, g3, b3, mm3, mv3, force_tiled=True, block_target_bytes=1024)
    jax.block_until_ready((y4, nmm4, nmv4))
    y4_r, mm4_r, mv4_r = _reference(x4, g3, b3, mm3, mv3)
    assert jnp.allclose(y4, y4_r, atol=1e-4, rtol=1e-4)
    assert jnp.allclose(nmm4, mm4_r, atol=1e-5, rtol=1e-5)
    assert jnp.allclose(nmv4, mv4_r, atol=1e-5, rtol=1e-5)

    print("KERNEL_OK")
</pallas_src>

<mosaic_0001>
module attributes {stable_mosaic.version = 11 : i64} {
  func.func @_bn_resident_kernel(%arg0: memref<2x4x256xf32, #tpu.memory_space<vmem>>, %arg1: memref<1x4x1xf32, #tpu.memory_space<vmem>>, %arg2: memref<1x4x1xf32, #tpu.memory_space<vmem>>, %arg3: memref<1x4x1xf32, #tpu.memory_space<vmem>>, %arg4: memref<1x4x1xf32, #tpu.memory_space<vmem>>, %arg5: memref<2x4x256xf32, #tpu.memory_space<vmem>>, %arg6: memref<1x4x1xf32, #tpu.memory_space<vmem>>, %arg7: memref<1x4x1xf32, #tpu.memory_space<vmem>>) attributes {dimension_semantics = [], scalar_prefetch = 0 : i64, scratch_operands = 0 : i64, tpu.core_type = #tpu.core_type<tc>} {
    %cst = arith.constant 0.000000e+00 : f32
    %0 = vector.broadcast %cst : f32 to vector<1x4x1xf32>
    %c0_i32 = arith.constant 0 : i32
    %c2_i32 = arith.constant 2 : i32
    %1 = arith.muli %c0_i32, %c2_i32 : i32
    %2 = arith.index_cast %1 : i32 to index
    %c0 = arith.constant 0 : index
    %c0_0 = arith.constant 0 : index
    %3 = vector.load %arg0[%2, %c0, %c0_0] : memref<2x4x256xf32, #tpu.memory_space<vmem>>, vector<2x4x256xf32>
    %cst_1 = arith.constant dense<0.000000e+00> : vector<4xf32>
    %4 = vector.multi_reduction <add>, %3, %cst_1 [0, 2] : vector<2x4x256xf32> to vector<4xf32>
    %5 = vector.shape_cast %4 : vector<4xf32> to vector<1x4x1xf32>
    %6 = arith.addf %0, %5 : vector<1x4x1xf32>
    %7 = arith.mulf %3, %3 : vector<2x4x256xf32>
    %cst_2 = arith.constant dense<0.000000e+00> : vector<4xf32>
    %8 = vector.multi_reduction <add>, %7, %cst_2 [0, 2] : vector<2x4x256xf32> to vector<4xf32>
    %9 = vector.shape_cast %8 : vector<4xf32> to vector<1x4x1xf32>
    %10 = arith.addf %0, %9 : vector<1x4x1xf32>
    %c1_i32 = arith.constant 1 : i32
    %c0_3 = arith.constant 0 : index
    %c0_4 = arith.constant 0 : index
    %c0_5 = arith.constant 0 : index
    %11 = vector.load %arg1[%c0_3, %c0_4, %c0_5] : memref<1x4x1xf32, #tpu.memory_space<vmem>>, vector<1x4x1xf32>
    %c0_6 = arith.constant 0 : index
    %c0_7 = arith.constant 0 : index
    %c0_8 = arith.constant 0 : index
    %12 = vector.load %arg2[%c0_6, %c0_7, %c0_8] : memref<1x4x1xf32, #tpu.memory_space<vmem>>, vector<1x4x1xf32>
    %c0_9 = arith.constant 0 : index
    %c0_10 = arith.constant 0 : index
    %c0_11 = arith.constant 0 : index
    %13 = vector.load %arg3[%c0_9, %c0_10, %c0_11] : memref<1x4x1xf32, #tpu.memory_space<vmem>>, vector<1x4x1xf32>
    %c0_12 = arith.constant 0 : index
    %c0_13 = arith.constant 0 : index
    %c0_14 = arith.constant 0 : index
    %14 = vector.load %arg4[%c0_12, %c0_13, %c0_14] : memref<1x4x1xf32, #tpu.memory_space<vmem>>, vector<1x4x1xf32>
    %cst_15 = arith.constant 0.001953125 : f32
    %15 = vector.broadcast %cst_15 : f32 to vector<1x4x1xf32>
    %16 = arith.mulf %6, %15 : vector<1x4x1xf32>
    %cst_16 = arith.constant 0.001953125 : f32
    %17 = vector.broadcast %cst_16 : f32 to vector<1x4x1xf32>
    %18 = arith.mulf %10, %17 : vector<1x4x1xf32>
    %19 = arith.mulf %16, %16 : vector<1x4x1xf32>
    %20 = arith.subf %18, %19 : vector<1x4x1xf32>
    %cst_17 = arith.constant 0.000000e+00 : f32
    %21 = vector.broadcast %cst_17 : f32 to vector<1x4x1xf32>
    %22 = arith.maximumf %20, %21 : vector<1x4x1xf32>
    %cst_18 = arith.constant 9.99999974E-6 : f32
    %23 = vector.broadcast %cst_18 : f32 to vector<1x4x1xf32>
    %24 = arith.addf %22, %23 : vector<1x4x1xf32>
    %25 = math.rsqrt %24 : vector<1x4x1xf32>
    %26 = arith.mulf %11, %25 : vector<1x4x1xf32>
    %27 = arith.mulf %26, %16 : vector<1x4x1xf32>
    %28 = arith.subf %12, %27 : vector<1x4x1xf32>
    %cst_19 = arith.constant 0.899999976 : f32
    %29 = vector.broadcast %cst_19 : f32 to vector<1x4x1xf32>
    %30 = arith.mulf %29, %13 : vector<1x4x1xf32>
    %cst_20 = arith.constant 1.000000e-01 : f32
    %31 = vector.broadcast %cst_20 : f32 to vector<1x4x1xf32>
    %32 = arith.mulf %31, %16 : vector<1x4x1xf32>
    %33 = arith.addf %30, %32 : vector<1x4x1xf32>
    %cst_21 = arith.constant 0.899999976 : f32
    %34 = vector.broadcast %cst_21 : f32 to vector<1x4x1xf32>
    %35 = arith.mulf %34, %14 : vector<1x4x1xf32>
    %cst_22 = arith.constant 1.000000e-01 : f32
    %36 = vector.broadcast %cst_22 : f32 to vector<1x4x1xf32>
    %37 = arith.mulf %36, %22 : vector<1x4x1xf32>
    %38 = arith.addf %35, %37 : vector<1x4x1xf32>
    %c0_23 = arith.constant 0 : index
    %c0_24 = arith.constant 0 : index
    %c0_25 = arith.constant 0 : index
    %39 = vector.load %arg6[%c0_23, %c0_24, %c0_25] : memref<1x4x1xf32, #tpu.memory_space<vmem>>, vector<1x4x1xf32>
    tpu.vector_store %arg6[%c0_23, %c0_24, %c0_25], %33 {strides = array<i32>} : memref<1x4x1xf32, #tpu.memory_space<vmem>>, vector<1x4x1xf32>,
    %c0_26 = arith.constant 0 : index
    %c0_27 = arith.constant 0 : index
    %c0_28 = arith.constant 0 : index
    %40 = vector.load %arg7[%c0_26, %c0_27, %c0_28] : memref<1x4x1xf32, #tpu.memory_space<vmem>>, vector<1x4x1xf32>
    tpu.vector_store %arg7[%c0_26, %c0_27, %c0_28], %38 {strides = array<i32>} : memref<1x4x1xf32, #tpu.memory_space<vmem>>, vector<1x4x1xf32>,
    %c0_i32_29 = arith.constant 0 : i32
    %c2_i32_30 = arith.constant 2 : i32
    %41 = arith.muli %c0_i32_29, %c2_i32_30 : i32
    %42 = arith.index_cast %41 : i32 to index
    %c0_31 = arith.constant 0 : index
    %c0_32 = arith.constant 0 : index
    %43 = vector.load %arg0[%42, %c0_31, %c0_32] : memref<2x4x256xf32, #tpu.memory_space<vmem>>, vector<2x4x256xf32>
    %44 = vector.broadcast %26 : vector<1x4x1xf32> to vector<2x4x256xf32>
    %45 = arith.mulf %43, %44 : vector<2x4x256xf32>
    %46 = vector.broadcast %28 : vector<1x4x1xf32> to vector<2x4x256xf32>
    %47 = arith.addf %45, %46 : vector<2x4x256xf32>
    %48 = arith.index_cast %41 : i32 to index
    %c0_33 = arith.constant 0 : index
    %c0_34 = arith.constant 0 : index
    %49 = vector.load %arg5[%48, %c0_33, %c0_34] : memref<2x4x256xf32, #tpu.memory_space<vmem>>, vector<2x4x256xf32>
    tpu.vector_store %arg5[%48, %c0_33, %c0_34], %47 {strides = array<i32>} : memref<2x4x256xf32, #tpu.memory_space<vmem>>, vector<2x4x256xf32>,
    %c1_i32_35 = arith.constant 1 : i32
    return
  }
}

</mosaic_0001>

<bundles_post_ra>
// kernel: tpu_custom_call.1
= control target key start
LH: loop header
LB: loop body
LE: loop exit
PB: predicated region body
PF: predicated region fallthrough
CT: control target
= control target key end

     0   :  { %vm32_vm0 = vcmask 1043456   ;;  %s280_s0 = inlined_call_operand.vmem [shape: f32[2,4,256], index: 0, kind: input, shape index: {}]   ;;  %s281_s1 = inlined_call_operand.vmem [shape: f32[1,4,1], index: 1, kind: input, shape index: {}]   ;;  %s282_s2 = inlined_call_operand.vmem [shape: f32[1,4,1], index: 2, kind: input, shape index: {}]   ;;  %s283_s3 = inlined_call_operand.vmem [shape: f32[1,4,1], index: 3, kind: input, shape index: {}]   ;;  %s284_s4 = inlined_call_operand.vmem [shape: f32[1,4,1], index: 4, kind: input, shape index: {}]   ;;  %s285_s5 = inlined_call_operand.hbm [shape: f32[2,4,256], index: 5, kind: output, shape index: {0}]   ;;  %s286_s6 = inlined_call_operand.vmem [shape: f32[1,4,1], index: 6, kind: output, shape index: {1}]   ;;  %s287_s7 = inlined_call_operand.vmem [shape: f32[1,4,1], index: 7, kind: output, shape index: {2}]  }
   0x1   :  { %v223_v0 = vld [vmem:[%s280_s0] sm:$0xff]  ;;  %v228_v1 = vld [vmem:[%s280_s0 + $0x8] sm:$0xff] }
   0x2   :  { %v28_v2 = vcombine.high %v223_v0, %v223_v0  ;;  %v29_v3 = vcombine.high %v228_v1, %v228_v1  ;;  %v33_v4 = vsel %vm32_vm0, %v223_v0, 0.0 }
   0x3   :  { %13 = vsyncpa [#allocation3], 0  ;;  %v43_v5 = vmul.f32 %v223_v0, %v223_v0  ;;  %v44_v6 = vmul.f32 %v228_v1, %v228_v1  ;;  %v36_v8 = vsel %vm32_vm0, %v228_v1, 0.0  ;;  %v175_v22 = vmov 0   ;;  %v63_v23 = vld [vmem:[%s283_s3] sm:$0xf] }
   0x4   :  { %v34_v7 = vsel %vm32_vm0, %v28_v2, 0.0  ;;  %v38_v13 = vsel %vm32_vm0, %v29_v3, 0.0  ;;  %145 = vset.pattern.permute.xlu1 %v175_v22  ;;  %146 = vset.pattern.permute.xlu0 %v175_v22  ;;  %v75_v25 = vmul.f32 0.9, %v63_v23  ;;  %vm81_vm1 = vcmask 3072  }
   0x5   :  { %v35_v9 = vadd.f32 %v34_v7, %v33_v4  ;;  %v47_v10 = vcombine.high %v43_v5, %v43_v5  ;;  %v48_v11 = vcombine.high %v44_v6, %v44_v6  ;;  %v51_v12 = vsel %vm32_vm0, %v43_v5, 0.0  ;;  %v64_v32 = vld [vmem:[%s284_s4] sm:$0xf] }
   0x6   :  { %v54_v16 = vsel %vm32_vm0, %v44_v6, 0.0  ;;  %v78_v34 = vmul.f32 0.9, %v64_v32  ;;  %v61_v39 = vld [vmem:[%s281_s1] sm:$0xf]  ;;  %v93_v47 = vlaneseq }
   0x7   :  { %v37_v14 = vadd.f32 %v36_v8, %v35_v9  ;;  %v52_v15 = vsel %vm32_vm0, %v47_v10, 0.0  ;;  %v56_v19 = vsel %vm32_vm0, %v48_v11, 0.0  ;;  %v62_v42 = vld [vmem:[%s282_s2] sm:$0xf]  ;;  %v176_v45 = vmov 839922192  }
   0x8   :  { %v53_v17 = vadd.f32 %v52_v15, %v51_v12  ;;  %v91_v46 = vunpack.c.l.s4 %v176_v45  ;;  %v94_v49 = vshrl.u32 %v93_v47, 7 }
   0x9   :  { %v39_v18 = vadd.f32 %v38_v13, %v37_v14 }
   0xa   :  { %v55_v20 = vadd.f32 %v54_v16, %v53_v17  ;;  %v92_v48 = vunpack.c.0.s8 %v91_v46 }
   0xb   :  { %40 = vadd.xlane.f32.xlu0 %v39_v18 }
   0xc   :  { %v57_v21 = vadd.f32 %v56_v19, %v55_v20  ;;  %v95_v50 = vsub.s32 %v92_v48, %v94_v49 }
   0xf   :  { %58 = vadd.xlane.f32.xlu0 %v57_v21 }
  0x98   :  { %v41_v24 = vpop.xlane.xlu0 %40 }
  0x99   :  { %v65_v26 = vmul.f32 0.001953125, %v41_v24 }
  0x9b   :  { %v76_v27 = vmul.f32 0.1, %v65_v26  ;;  %v67_v30 = vmul.f32 %v65_v26, %v65_v26 }
  0x9c   :  { %v59_v28 = vpop.xlane.xlu0 %58 }
  0x9d   :  { %v77_v29 = vadd.f32 %v76_v27, %v75_v25  ;;  %v66_v31 = vmul.f32 0.001953125, %v59_v28 }
  0x9f   :  { %82 = vst.msk [vmem:[%s286_s6] sm:$0xf] %vm81_vm1, %v77_v29  ;;  %v68_v33 = vsub.f32 %v66_v31, %v67_v30  ;;  %s177_s6 = smov [#allocation2]  }
  0xa0   :  { %s121_s1 = sshll.u32 %s177_s6, 4  ;;  %s122_s1 = int_to_ptr.vmem [resolvable:$true] %s121_s1 }
  0xa1   :  { %v69_v35 = vmax.f32 %v68_v33, 0.0  ;;  %s151_s2 = scalar_lea.vmem %s122_s1, 256  ;;  %p156_p1 = scmp.lt.s32.totalorder %s122_s1, %s122_s1 }
  0xa2   :  { %p152_p0 = scmp.ne.s32.totalorder %s122_s1, %s151_s2  ;;  %p157_p2 = scmp.lt.s32.totalorder %s151_s2, %s151_s2 }
  0xa3   :  { %v70_v36 = vadd.f32 1e-05, %v69_v35  ;;  %v79_v37 = vmul.f32 0.1, %v69_v35 }
  0xa4   :  { %p158_p3 = por %p157_p2, %p156_p1 }
  0xa5   :  { %149 = vrsqrt.f32 %v70_v36  ;;  %v80_v38 = vadd.f32 %v79_v37, %v78_v34 }
  0xa6   :  { %p159_p4 = pnand %p158_p3, %p152_p0 }
  0xa7   :  { %83 = vst.msk [vmem:[%s287_s7] sm:$0xf] %vm81_vm1, %v80_v38 }
  0xaf   :  { %v150_v40 = vpop.eup %149 }
  0xb0   :  { %v72_v41 = vmul.f32 %v150_v40, %v61_v39 }
  0xb2   :  { %88 = vperm.xlu1 %145, %v72_v41   ;;  %v73_v43 = vmul.f32 %v72_v41, %v65_v26 }
  0xb4   :  { %v74_v44 = vsub.f32 %v62_v42, %v73_v43 }
  0xb6   :  { %102 = vperm.xlu1 %145, %v74_v44  }
 0x131   :  { %v89_v51 = vpop.permute.xlu1 %88 }
 0x132   :  { %v96_v52 = vrot.slane %v89_v51, %v95_v50 }
 0x134   :  { %v98_v54 = vmul.f32 %v96_v52, %v223_v0  ;;  %v99_v55 = vmul.f32 %v96_v52, %v228_v1 }
 0x135   :  { %v103_v53 = vpop.permute.xlu1 %102 }
 0x136   :  { %v110_v56 = vrot.slane %v103_v53, %v95_v50 }
 0x138   :  { %v112_v57 = vadd.f32 %v110_v56, %v98_v54  ;;  %v113_v58 = vadd.f32 %v110_v56, %v99_v55 }
 0x13a   :  { %114 = vst [vmem:[#allocation2] sm:$0xff] %v112_v57  ;;  %115 = vst [vmem:[#allocation2 + $0x8] sm:$0xff] %v113_v58 }
 0x13b   :  { %162 = shalt.err (!%p159_p4)
}
 0x13c   :  { %s163_s15 = scalar_lea.hbm %s285_s5, 256 }
 0x13d   :  { %p164_p5 = scmp.ne.s32.totalorder %s285_s5, %s163_s15  ;;  %p167_p6 = scmp.lt.u32.totalorder %s163_s15, %s285_s5 }
 0x13f   :  { %p169_p7 = pnand %p167_p6, %p164_p5 }
 0x141   :  { %172 = shalt.err (!%p169_p7)
}
 0x142   :  { %s178_s20 = smov 128   ;;  %s179_s21 = smov 8  }
 0x143   :  { %127 = dma.vmem_to_hbm [thread:$0]  %s122_s1, 256, %s285_s5, [#allocation3], %s178_s20, %s178_s20, %s179_s21  }
 0x144   :  { %173 = dma.done.wait [#allocation3], 256  }
 0x145   :  { %174 = vsyncadd [#allocation3], 4294967040 }
 0x146   :  { %139 = vsyncpa [#allocation3], 1 }

</bundles_post_ra>
